<compile_context>
chip_gen: v5e
topology: v5e:2x2
jax: 0.10.0
libtpu: 0.0.40
codegen_flags: <defaults>
</compile_context>

<pallas_src>
import jax
import jax.numpy as jnp
from jax.experimental import pallas as pl
from jax.experimental.pallas import tpu as pltpu


# ----------------------------- Pallas kernel -------------------------------

def _affine_kernel(x_ref, a_ref, b_ref, y_ref):
    # y = x * a + b   with a, b (shape [1, D]) broadcast over the batch tile.
    y_ref[...] = x_ref[...] * a_ref[...] + b_ref[...]


def _round_up(n, m):
    return ((n + m - 1) // m) * m


def _affine_elementwise(x, a, b):
    """out = x * a + b, with x: [B, D], a/b: [1, D]. Tiled Pallas kernel."""
    x = jnp.asarray(x, jnp.float32)
    a = jnp.asarray(a, jnp.float32)
    b = jnp.asarray(b, jnp.float32)
    B, D = x.shape

    # Lane-dense feature dim: pad to a multiple of 128.
    Dp = _round_up(max(D, 128), 128)

    # Batch tile: big enough to amortize per-step overhead (~512 rows reaches
    # the HBM roofline), small enough that the ~4 resident buffers
    # (double-buffered input + output tiles) fit comfortably in v7x's 64 MiB
    # VMEM with the default scoped limit.
    max_rows = (6 * 1024 * 1024) // (Dp * 4)          # ~24 MiB across 4 bufs
    max_rows = max(8, (max_rows // 8) * 8)
    TB = min(512, max_rows, _round_up(B, 8))

    Bp = _round_up(B, TB)

    xp = jnp.pad(x, ((0, Bp - B), (0, Dp - D))) if (Bp != B or Dp != D) else x
    ap = jnp.pad(a, ((0, 0), (0, Dp - D))) if Dp != D else a
    bp = jnp.pad(b, ((0, 0), (0, Dp - D))) if Dp != D else b

    out = pl.pallas_call(
        _affine_kernel,
        out_shape=jax.ShapeDtypeStruct((Bp, Dp), x.dtype),
        grid=(Bp // TB,),
        in_specs=[
            pl.BlockSpec((TB, Dp), lambda i: (i, 0)),   # x tile
            pl.BlockSpec((1, Dp), lambda i: (0, 0)),    # scale (broadcast row)
            pl.BlockSpec((1, Dp), lambda i: (0, 0)),    # shift (broadcast row)
        ],
        out_specs=pl.BlockSpec((TB, Dp), lambda i: (i, 0)),
        compiler_params=pltpu.CompilerParams(
            dimension_semantics=("parallel",)),
    )(xp, ap, bp)

    if Bp != B or Dp != D:
        out = out[:B, :D]
    return out


# --------------------------- Flow class hierarchy ---------------------------

class Flow:
    """Abstract flow base, mirroring the torch nn.Module `Flow`."""

    def forward(self, x):
        # TODO(synk): base Flow.forward is abstract (NotImplementedError) in
        # the reference module; concrete compute lives in AffineFlow below.
        raise NotImplementedError

    def inverse(self, y):
        raise NotImplementedError

    def get_inverse(self):
        return InverseFlow(self)


class InverseFlow(Flow):
    """Inverse wrapper: swaps forward/inverse of a base flow."""

    def __init__(self, base_flow):
        super().__init__()
        self.base_flow = base_flow
        if hasattr(base_flow, "domain"):
            self.codomain = base_flow.domain
        if hasattr(base_flow, "codomain"):
            self.domain = base_flow.codomain

    def forward(self, x):
        y, log_det_jac = self.base_flow.inverse(x)
        return (y, log_det_jac)

    def inverse(self, y):
        x, inv_log_det_jac = self.base_flow.forward(y)
        return (x, inv_log_det_jac)


class AffineFlow(Flow):
    """Concrete elementwise affine flow whose hot path runs in Pallas."""

    def __init__(self, dim, key):
        super().__init__()
        k1, k2 = jax.random.split(key)
        # Deterministic synthetic parameters (no checkpoint load).
        self.log_scale = 0.1 * jax.random.normal(k1, (1, dim), jnp.float32)
        self.shift = jax.random.normal(k2, (1, dim), jnp.float32)
        # Hoisted, data-independent quantities (computed once, outside the
        # per-tile kernel body): exp(+/-s) and the log-det scalar.
        self.scale = jnp.exp(self.log_scale)
        self.inv_scale = jnp.exp(-self.log_scale)
        self.sum_log_scale = jnp.sum(self.log_scale)

    def forward(self, x):
        # y = x * exp(s) + t,  log_det_jac = sum(s) per batch row
        y = _affine_elementwise(x, self.scale, self.shift)
        log_det_jac = jnp.full((x.shape[0],), self.sum_log_scale, jnp.float32)
        return y, log_det_jac

    def inverse(self, y):
        # x = (y - t) * exp(-s) = y * exp(-s) + (-t * exp(-s))
        x = _affine_elementwise(y, self.inv_scale, -self.shift * self.inv_scale)
        inv_log_det_jac = jnp.full((y.shape[0],), -self.sum_log_scale,
                                   jnp.float32)
        return x, inv_log_det_jac


# --------------------------------- driver -----------------------------------

if __name__ == "__main__":
    key = jax.random.PRNGKey(0)
    kx, kp = jax.random.split(key)

    batch, dim = 8, 32
    x = jax.random.normal(kx, (batch, dim), jnp.float32)

    flow = AffineFlow(dim, kp)

    # forward transform
    y, log_det_jac = flow.forward(x)

    # InverseFlow wrapper: its forward is the base flow's inverse
    inv_flow = flow.get_inverse()
    x_rec, inv_log_det_jac = inv_flow.forward(y)

    jax.block_until_ready((y, log_det_jac, x_rec, inv_log_det_jac))

    assert y.shape == (batch, dim)
    assert log_det_jac.shape == (batch,)
    assert x_rec.shape == (batch, dim)
    assert inv_log_det_jac.shape == (batch,)
    assert bool(jnp.allclose(x_rec, x, atol=1e-5)), "round-trip mismatch"
    assert bool(jnp.allclose(log_det_jac + inv_log_det_jac, 0.0, atol=1e-5))

    print("KERNEL_OK")
</pallas_src>

<mosaic_0001>
module attributes {stable_mosaic.version = 11 : i64} {
  func.func @_affine_kernel(%arg0: i32, %arg1: memref<8x128xf32, #tpu.memory_space<vmem>>, %arg2: memref<1x128xf32, #tpu.memory_space<vmem>>, %arg3: memref<1x128xf32, #tpu.memory_space<vmem>>, %arg4: memref<8x128xf32, #tpu.memory_space<vmem>>) attributes {dimension_semantics = [#tpu.dimension_semantics<parallel>], iteration_bounds = array<i64: 1>, scalar_prefetch = 0 : i64, scratch_operands = 0 : i64, tpu.core_type = #tpu.core_type<tc>, window_params = [{transform_indices = @transform_0, window_bounds = array<i64: 8, 128>}, {pipeline_mode = #tpu.pipeline_mode<synchronous>, transform_indices = @transform_1, window_bounds = array<i64: 1, 128>}, {pipeline_mode = #tpu.pipeline_mode<synchronous>, transform_indices = @transform_2, window_bounds = array<i64: 1, 128>}, {transform_indices = @transform_3, window_bounds = array<i64: 8, 128>}]} {
    %c0 = arith.constant 0 : index
    %c0_0 = arith.constant 0 : index
    %0 = vector.load %arg1[%c0, %c0_0] : memref<8x128xf32, #tpu.memory_space<vmem>>, vector<8x128xf32>
    %c0_1 = arith.constant 0 : index
    %c0_2 = arith.constant 0 : index
    %1 = vector.load %arg2[%c0_1, %c0_2] : memref<1x128xf32, #tpu.memory_space<vmem>>, vector<1x128xf32>
    %2 = vector.broadcast %1 : vector<1x128xf32> to vector<8x128xf32>
    %3 = arith.mulf %0, %2 : vector<8x128xf32>
    %c0_3 = arith.constant 0 : index
    %c0_4 = arith.constant 0 : index
    %4 = vector.load %arg3[%c0_3, %c0_4] : memref<1x128xf32, #tpu.memory_space<vmem>>, vector<1x128xf32>
    %5 = vector.broadcast %4 : vector<1x128xf32> to vector<8x128xf32>
    %6 = arith.addf %3, %5 : vector<8x128xf32>
    %c0_5 = arith.constant 0 : index
    %c0_6 = arith.constant 0 : index
    %7 = vector.load %arg4[%c0_5, %c0_6] : memref<8x128xf32, #tpu.memory_space<vmem>>, vector<8x128xf32>
    tpu.vector_store %arg4[%c0_5, %c0_6], %6 {strides = array<i32>} : memref<8x128xf32, #tpu.memory_space<vmem>>, vector<8x128xf32>,
    return
  }
  func.func @transform_0(%arg0: i32) -> (i32, i32) {
    %c0_i32 = arith.constant 0 : i32
    %c0_i32_0 = arith.constant 0 : i32
    return %arg0, %c0_i32 : i32, i32
  }
  func.func @transform_1(%arg0: i32) -> (i32, i32) {
    %c0_i32 = arith.constant 0 : i32
    %c0_i32_0 = arith.constant 0 : i32
    %c0_i32_1 = arith.constant 0 : i32
    return %c0_i32, %c0_i32_0 : i32, i32
  }
  func.func @transform_2(%arg0: i32) -> (i32, i32) {
    %c0_i32 = arith.constant 0 : i32
    %c0_i32_0 = arith.constant 0 : i32
    %c0_i32_1 = arith.constant 0 : i32
    return %c0_i32, %c0_i32_0 : i32, i32
  }
  func.func @transform_3(%arg0: i32) -> (i32, i32) {
    %c0_i32 = arith.constant 0 : i32
    %c0_i32_0 = arith.constant 0 : i32
    return %arg0, %c0_i32 : i32, i32
  }
}

</mosaic_0001>

<bundles_post_ra>
// kernel: tpu_custom_call.1
= control target key start
LH: loop header
LB: loop body
LE: loop exit
PB: predicated region body
PF: predicated region fallthrough
CT: control target
= control target key end

     0   :  { %8 = vsyncpa [#allocation3], 0  ;;  %s191_s0 = inlined_call_operand.hbm [shape: f32[8,128], index: 0, kind: input, shape index: {}]   ;;  %s192_s1 = inlined_call_operand.hbm [shape: f32[1,128], index: 1, kind: input, shape index: {}]   ;;  %s193_s2 = inlined_call_operand.vmem [shape: f32[1,128], index: 2, kind: input, shape index: {}]   ;;  %s194_s3 = inlined_call_operand.hbm [shape: f32[8,128], index: 3, kind: output, shape index: {}]  }
   0x1   :  { %9 = vsyncpa [#allocation6], 0 }
   0x2   :  { %10 = vsyncpa [#allocation4], 0  ;;  %s16_s14 = sshll.u32 %s191_s0, 4  ;;  %s156_s15 = smov [#allocation2]   ;;  %s17_s14 = int_to_ptr.hbm [resolvable:$true] %s16_s14 }
   0x3   :  { %s18_s16 = sshll.u32 %s156_s15, 4  ;;  %s27_s19 = sshll.u32 %s192_s1, 4  ;;  %s19_s16 = int_to_ptr.vmem [resolvable:$true] %s18_s16  ;;  %s28_s19 = int_to_ptr.hbm [resolvable:$true] %s27_s19 }
   0x4   :  { %21 = dma.hbm_to_vmem [thread:$0]  %s17_s14, 128, %s19_s16, [#allocation3]  }
   0x5   :  { %s157_s20 = smov [#allocation5]  }
   0x6   :  { %s29_s21 = sshll.u32 %s157_s20, 4  ;;  %s30_s21 = int_to_ptr.vmem [resolvable:$true] %s29_s21 }
   0x7   :  { %32 = dma.hbm_to_vmem [thread:$0]  %s28_s19, 16, %s30_s21, [#allocation6]  }
   0x8   :  { %150 = dma.done.wait [#allocation3], 128  }
   0x9   :  { %151 = vsyncadd [#allocation3], 4294967168 }
   0xa   :  { %152 = dma.done.wait [#allocation6], 16  }
   0xb   :  { %153 = vsyncadd [#allocation6], 4294967280  ;;  %v43_v0 = vld [vmem:[#allocation2] sm:$0xff]  ;;  %v76_v1 = vld [vmem:[#allocation5] ss:$0 sm:$0xff]  ;;  %s158_s23 = smov [#allocation7]  }
   0xc   :  { %v77_v2 = vld [vmem:[%s193_s2] ss:$0 sm:$0xff]  ;;  %s60_s24 = sshll.u32 %s158_s23, 4  ;;  %s62_s26 = sshll.u32 %s194_s3, 4  ;;  %v48_v3 = vmul.f32 %v76_v1, %v43_v0  ;;  %s61_s24 = int_to_ptr.vmem [resolvable:$true] %s60_s24  ;;  %s63_s26 = int_to_ptr.hbm [resolvable:$true] %s62_s26 }
   0xe   :  { %v53_v4 = vadd.f32 %v77_v2, %v48_v3 }
  0x10   :  { %54 = vst [vmem:[#allocation7] sm:$0xff] %v53_v4 }
  0x11   :  { %65 = dma.vmem_to_hbm [thread:$0]  %s61_s24, 128, %s63_s26, [#allocation4]  }
  0x12   :  { %154 = dma.done.wait [#allocation4], 128  }
  0x13   :  { %155 = vsyncadd [#allocation4], 4294967168 }
  0x14   :  { %70 = vsyncpa [#allocation3], 1 }
  0x15   :  { %71 = vsyncpa [#allocation6], 1 }
  0x16   :  { %72 = vsyncpa [#allocation4], 1 }

</bundles_post_ra>
